<compile_context>
chip_gen: v5e
topology: v5e:2x2
jax: 0.10.0
libtpu: 0.0.40
codegen_flags: <defaults>
</compile_context>

<pallas_src>
import jax
import jax.numpy as jnp
from jax.experimental import pallas as pl
from jax.experimental.pallas import tpu as pltpu


def mlp_kernel(x_ref, w_ref, b_ref, o_ref, acc_ref):
    """One (batch_tile, layer) grid step: acc <- act(acc @ W_l + b_l)."""
    l = pl.program_id(1)
    last = pl.num_programs(1) - 1

    # First layer of this batch tile: load activations into the f32 VMEM
    # accumulator that is carried across the layer (arbitrary) grid axis.
    @pl.when(l == 0)
    def _():
        acc_ref[...] = x_ref[...].astype(jnp.float32)

    # bf16 matmul on the MXU, f32 accumulation; f32 epilogue.
    a = acc_ref[...].astype(jnp.bfloat16)        # (tile_n, dim_p)
    w = w_ref[...]                               # (dim_p, dim_p), bf16
    y = jnp.dot(a, w, preferred_element_type=jnp.float32)
    y = y + b_ref[...]                           # (1, dim_p) f32 bias broadcast

    @pl.when(l < last)                           # ReLU between layers only
    def _():
        acc_ref[...] = jnp.maximum(y, 0.0)

    @pl.when(l == last)                          # last layer: no ReLU, emit
    def _():
        acc_ref[...] = y
        o_ref[...] = y.astype(o_ref.dtype)


def mlp_forward(x, weights, biases, *, tile_n=None):
    """
    x:       (N, dim)        float32
    weights: (h, dim, dim)   float32, (in, out) orientation (kernel does x @ W)
    biases:  (h, 1, dim)     float32
    """
    n, dim = x.shape
    h = weights.shape[0]

    # ---- padding: lane-dense feature axis, sublane-aligned batch tile ------
    dim_p = pl.cdiv(dim, 128) * 128              # multiple of 128 lanes
    if tile_n is None:
        # Small batches: one 8-row-aligned tile.  Large batches: 256-row tiles
        # so the grid exposes >=2 "parallel" steps (both v7x TensorCores) and
        # the per-step working set (tile_n*dim_p*4 act + 2*dim_p^2*2 weights)
        # stays well inside the scoped VMEM limit on every generation.
        tile_n = min(256, pl.cdiv(n, 8) * 8)
    n_p = pl.cdiv(n, tile_n) * tile_n

    x_p = jnp.zeros((n_p, dim_p), x.dtype).at[:n, :dim].set(x)
    # Cast weights to bf16 in the wrapper: halves weight DMA bytes and VMEM.
    w_p = jnp.zeros((h, dim_p, dim_p), jnp.bfloat16).at[:, :dim, :dim].set(
        weights.astype(jnp.bfloat16))
    b_p = jnp.zeros((h, 1, dim_p), jnp.float32).at[:, :, :dim].set(biases)

    grid = (n_p // tile_n, h)                    # (batch tiles, layers)

    out_p = pl.pallas_call(
        mlp_kernel,
        out_shape=jax.ShapeDtypeStruct((n_p, dim_p), x.dtype),
        grid_spec=pltpu.PrefetchScalarGridSpec(
            num_scalar_prefetch=0,
            grid=grid,
            in_specs=[
                # activations: one batch tile, constant across the layer axis
                pl.BlockSpec((tile_n, dim_p), lambda i, l: (i, 0)),
                # weights: one layer per grid step (streamed, double-buffered)
                pl.BlockSpec((None, dim_p, dim_p), lambda i, l: (l, 0, 0)),
                # bias: one layer per grid step
                pl.BlockSpec((None, 1, dim_p), lambda i, l: (l, 0, 0)),
            ],
            out_specs=pl.BlockSpec((tile_n, dim_p), lambda i, l: (i, 0)),
            scratch_shapes=[
                pltpu.VMEM((tile_n, dim_p), jnp.float32),   # activation carry
            ],
        ),
        compiler_params=pltpu.CompilerParams(
            dimension_semantics=("parallel", "arbitrary")),
    )(x_p, w_p, b_p)

    return out_p[:n, :dim]
    # TODO(synk): for dim large enough that one (dim_p, dim_p) weight block
    # no longer fits VMEM comfortably (e.g. dim >= 4096), add K/N tiling of
    # the per-layer weight with an extra reduction grid axis.


def init_params(key, dim, h):
    """Deterministic init mirroring torch.nn.Linear default:
    U(-1/sqrt(fan_in), 1/sqrt(fan_in)) for both weight and bias."""
    bound = 1.0 / jnp.sqrt(jnp.float32(dim))
    kw, kb = jax.random.split(key)
    # PyTorch convention: weight is (out, in)
    w_torch = jax.random.uniform(kw, (h, dim, dim), jnp.float32, -bound, bound)
    b = jax.random.uniform(kb, (h, dim), jnp.float32, -bound, bound)
    # transpose to (in, out) so the kernel computes x @ W (== x @ W_torch.T)
    w = jnp.transpose(w_torch, (0, 2, 1))
    return w, b.reshape(h, 1, dim)


def mlp_reference(x, weights, biases, *, matmul_dtype=jnp.float32):
    acc = x.astype(jnp.float32)
    h = weights.shape[0]
    for i in range(h):
        acc = jnp.dot(acc.astype(matmul_dtype), weights[i].astype(matmul_dtype),
                      preferred_element_type=jnp.float32) + biases[i]
        if i < h - 1:
            acc = jnp.maximum(acc, 0.0)
    return acc


if __name__ == "__main__":
    dim = 32      # feature dimension of the MLP
    h = 4         # number of Linear layers (ReLU between all but the last)
    batch = 8

    key = jax.random.PRNGKey(0)
    kx, kp = jax.random.split(key)
    x = jax.random.normal(kx, (batch, dim), jnp.float32)
    w, b = init_params(kp, dim, h)

    out = jax.block_until_ready(mlp_forward(x, w, b))
    assert out.shape == (batch, dim)

    # Tight check vs a bf16-matmul reference (same numerics as the kernel),
    # loose check vs the pure-f32 reference (bf16 matmul rounding only).
    ref_bf16 = mlp_reference(x, w, b, matmul_dtype=jnp.bfloat16)
    ref_f32 = mlp_reference(x, w, b, matmul_dtype=jnp.float32)
    assert jnp.allclose(out, ref_bf16, atol=1e-3, rtol=1e-3), "mismatch vs bf16 reference"
    assert jnp.allclose(out, ref_f32, atol=5e-2, rtol=5e-2), "mismatch vs f32 reference"

    print("KERNEL_OK")
</pallas_src>

<mosaic_0001>
module attributes {stable_mosaic.version = 11 : i64} {
  func.func @mlp_kernel(%arg0: i32, %arg1: i32, %arg2: memref<8x128xf32, #tpu.memory_space<vmem>>, %arg3: memref<1x128x128xbf16, #tpu.memory_space<vmem>>, %arg4: memref<1x1x128xf32, #tpu.memory_space<vmem>>, %arg5: memref<8x128xf32, #tpu.memory_space<vmem>>, %arg6: memref<8x128xf32, #tpu.memory_space<vmem>>) attributes {dimension_semantics = [#tpu.dimension_semantics<parallel>, #tpu.dimension_semantics<arbitrary>], iteration_bounds = array<i64: 1, 4>, scalar_prefetch = 0 : i64, scratch_operands = 1 : i64, tpu.core_type = #tpu.core_type<tc>, window_params = [{transform_indices = @transform_0, window_bounds = array<i64: 8, 128>}, {transform_indices = @transform_1, window_bounds = array<i64: 1, 128, 128>}, {transform_indices = @transform_2, window_bounds = array<i64: 1, 1, 128>}, {transform_indices = @transform_3, window_bounds = array<i64: 8, 128>}]} {
    %c0_i32 = arith.constant 0 : i32
    %0 = arith.cmpi eq, %arg1, %c0_i32 : i32
    %1 = arith.extui %0 : i1 to i32
    %c0_i32_0 = arith.constant 0 : i32
    %2 = arith.cmpi ne, %1, %c0_i32_0 : i32
    scf.if %2 {
      %c0_11 = arith.constant 0 : index
      %c0_12 = arith.constant 0 : index
      %18 = vector.load %arg2[%c0_11, %c0_12] : memref<8x128xf32, #tpu.memory_space<vmem>>, vector<8x128xf32>
      %c0_13 = arith.constant 0 : index
      %c0_14 = arith.constant 0 : index
      %19 = vector.load %arg6[%c0_13, %c0_14] : memref<8x128xf32, #tpu.memory_space<vmem>>, vector<8x128xf32>
      tpu.vector_store %arg6[%c0_13, %c0_14], %18 {strides = array<i32>} : memref<8x128xf32, #tpu.memory_space<vmem>>, vector<8x128xf32>,
    } else {
    }
    %c0 = arith.constant 0 : index
    %c0_1 = arith.constant 0 : index
    %3 = vector.load %arg6[%c0, %c0_1] : memref<8x128xf32, #tpu.memory_space<vmem>>, vector<8x128xf32>
    %4 = arith.truncf %3 : vector<8x128xf32> to vector<8x128xbf16>
    %c0_2 = arith.constant 0 : index
    %c0_3 = arith.constant 0 : index
    %c0_4 = arith.constant 0 : index
    %5 = vector.load %arg3[%c0_2, %c0_3, %c0_4] : memref<1x128x128xbf16, #tpu.memory_space<vmem>>, vector<1x128x128xbf16>
    %6 = vector.shape_cast %5 : vector<1x128x128xbf16> to vector<128x128xbf16>
    %cst = arith.constant dense<0.000000e+00> : vector<8x128xf32>
    %7 = tpu.matmul %4, %6, %cst {dimension_numbers = #tpu.dot_dimension_numbers<[1], [0], [0], [1], [0, 0, 1, 1], [], []>} : vector<8x128xbf16>, vector<128x128xbf16>, vector<8x128xf32> -> vector<8x128xf32>
    %c0_5 = arith.constant 0 : index
    %c0_6 = arith.constant 0 : index
    %c0_7 = arith.constant 0 : index
    %8 = vector.load %arg4[%c0_5, %c0_6, %c0_7] : memref<1x1x128xf32, #tpu.memory_space<vmem>>, vector<1x1x128xf32>
    %9 = vector.shape_cast %8 : vector<1x1x128xf32> to vector<1x128xf32>
    %10 = vector.broadcast %9 : vector<1x128xf32> to vector<8x128xf32>
    %11 = arith.addf %7, %10 : vector<8x128xf32>
    %c3_i32 = arith.constant 3 : i32
    %12 = arith.cmpi slt, %arg1, %c3_i32 : i32
    %13 = arith.extui %12 : i1 to i32
    %c0_i32_8 = arith.constant 0 : i32
    %14 = arith.cmpi ne, %13, %c0_i32_8 : i32
    scf.if %14 {
      %cst_11 = arith.constant 0.000000e+00 : f32
      %18 = vector.broadcast %cst_11 : f32 to vector<8x128xf32>
      %19 = arith.maximumf %11, %18 : vector<8x128xf32>
      %c0_12 = arith.constant 0 : index
      %c0_13 = arith.constant 0 : index
      %20 = vector.load %arg6[%c0_12, %c0_13] : memref<8x128xf32, #tpu.memory_space<vmem>>, vector<8x128xf32>
      tpu.vector_store %arg6[%c0_12, %c0_13], %19 {strides = array<i32>} : memref<8x128xf32, #tpu.memory_space<vmem>>, vector<8x128xf32>,
    } else {
    }
    %c3_i32_9 = arith.constant 3 : i32
    %15 = arith.cmpi eq, %arg1, %c3_i32_9 : i32
    %16 = arith.extui %15 : i1 to i32
    %c0_i32_10 = arith.constant 0 : i32
    %17 = arith.cmpi ne, %16, %c0_i32_10 : i32
    scf.if %17 {
      %c0_11 = arith.constant 0 : index
      %c0_12 = arith.constant 0 : index
      %18 = vector.load %arg6[%c0_11, %c0_12] : memref<8x128xf32, #tpu.memory_space<vmem>>, vector<8x128xf32>
      tpu.vector_store %arg6[%c0_11, %c0_12], %11 {strides = array<i32>} : memref<8x128xf32, #tpu.memory_space<vmem>>, vector<8x128xf32>,
      %c0_13 = arith.constant 0 : index
      %c0_14 = arith.constant 0 : index
      %19 = vector.load %arg5[%c0_13, %c0_14] : memref<8x128xf32, #tpu.memory_space<vmem>>, vector<8x128xf32>
      tpu.vector_store %arg5[%c0_13, %c0_14], %11 {strides = array<i32>} : memref<8x128xf32, #tpu.memory_space<vmem>>, vector<8x128xf32>,
    } else {
    }
    return
  }
  func.func @transform_0(%arg0: i32, %arg1: i32) -> (i32, i32) {
    %c0_i32 = arith.constant 0 : i32
    %c0_i32_0 = arith.constant 0 : i32
    return %arg0, %c0_i32 : i32, i32
  }
  func.func @transform_1(%arg0: i32, %arg1: i32) -> (i32, i32, i32) {
    %c0_i32 = arith.constant 0 : i32
    %c0_i32_0 = arith.constant 0 : i32
    %c0_i32_1 = arith.constant 0 : i32
    return %arg1, %c0_i32, %c0_i32_0 : i32, i32, i32
  }
  func.func @transform_2(%arg0: i32, %arg1: i32) -> (i32, i32, i32) {
    %c0_i32 = arith.constant 0 : i32
    %c0_i32_0 = arith.constant 0 : i32
    %c0_i32_1 = arith.constant 0 : i32
    return %arg1, %c0_i32, %c0_i32_0 : i32, i32, i32
  }
  func.func @transform_3(%arg0: i32, %arg1: i32) -> (i32, i32) {
    %c0_i32 = arith.constant 0 : i32
    %c0_i32_0 = arith.constant 0 : i32
    return %arg0, %c0_i32 : i32, i32
  }
}

</mosaic_0001>

<bundles_post_ra>
// kernel: tpu_custom_call.1
= control target key start
LH: loop header
LB: loop body
LE: loop exit
PB: predicated region body
PF: predicated region fallthrough
CT: control target
= control target key end

     0   :  { %8 = vsyncpa [#allocation4], 0  ;;  %s929_s0 = inlined_call_operand.hbm [shape: f32[8,128], index: 0, kind: input, shape index: {}]   ;;  %s930_s1 = inlined_call_operand.hbm [shape: bf16[4,128,128], index: 1, kind: input, shape index: {}]   ;;  %s931_s2 = inlined_call_operand.hbm [shape: f32[4,1,128], index: 2, kind: input, shape index: {}]   ;;  %s932_s3 = inlined_call_operand.hbm [shape: f32[8,128], index: 3, kind: output, shape index: {}]  }
   0x1   :  { %9 = vsyncpa [#allocation7], 0 }
   0x2   :  { %11 = vsyncpa [#allocation7 + $0x1], 0 }
   0x3   :  { %12 = vsyncpa [#allocation5], 0  ;;  %s794_s12 = smov 0   ;;  %s796_s13 = smov 0  }
   0x4   :  { %s798_s14 = smov 0   ;;  %s800_s15 = smov 0  }
   0x5   :  { %s802_s16 = smov 0   ;;  %s804_s17 = smov 0  }
   0x6 LB: > { %s27_s18 = sadd.s32 1, %s764_s16  ;;  %s63_s19 = sadd.s32 1, %s756_s14  ;;  %s768_s17 = sphi %s804_s17, %s18_s17   ;;  %s764_s16 = sphi %s802_s16, %s941_s16   ;;  %s760_s15 = sphi %s800_s15, %s940_s15   ;;  %s756_s14 = sphi %s798_s14, %s939_s14   ;;  %s752_s13 = sphi %s796_s13, %s938_s13   ;;  %s748_s12 = sphi %s794_s12, %s937_s12  }
   0x7   : > { %p28_p0 = scmp.ge.s32.totalorder %s27_s18, 4  ;;  %p70_p1 = scmp.ne.s32.totalorder %s756_s14, %s752_s13 }
   0x8   : > { %p71_p2 = scmp.eq.s32.totalorder %s768_s17, 0  ;;  %p535_p4 = scmp.lt.s32.totalorder %s768_s17, 4 }
   0x9   : > { %s943_s18 = smov (%p28_p0, %s27_s18), 0  ;;  %s166_s22 = sand.u32 1, %s768_s17  }
   0xa   : > { %p831_p3 = por %p71_p2, %p70_p1  ;;  %s60_s21 = ssub.s32 %s764_s16, %s943_s18 }
   0xb   : > { %p61_p5 = scmp.eq.s32.totalorder %s60_s21, 0  ;;  %s168_s23 = sand.u32 1, %s756_s14  }
   0xc   : > { %s502_s24 = sshll.u32 %s764_s16, 6  ;;  %s457_s26 = sshll.u32 %s168_s23, 6 }
   0xd   : > { %s842_s25 = scalar_select %p61_p5, %s756_s14, %s63_s19  }
   0xe   : > { %s175_s29 = scalar_lea.hbm %s930_s1, %s502_s24  ;;  %s170_s4 = scalar_lea.vmem [#allocation6], %s457_s26 }
   0xf   : > { %s176_s30 = sshll.u32 %s175_s29, 4  ;;  %s178_s5 = sshll.u32 %s170_s4, 4  ;;  %s177_s30 = int_to_ptr.hbm [resolvable:$true] %s176_s30  ;;  %s179_s5 = int_to_ptr.vmem [resolvable:$true] %s178_s5 }
  0x10   : > { %p853_p6 = pnand %p535_p4, %p831_p3  ;;  %s167_s7 = scalar_lea.sflag [#allocation7], %s166_s22 }
  0x11   : > { %s770_s8 = smov 64   ;;  %s771_s9 = smov 4  }
  0x12   : > { %530 = dma.hbm_to_vmem [thread:$0]  (!%p853_p6), %s177_s30, 1024, %s179_s5, %s167_s7, %s770_s8, %s770_s8, %s771_s9  }
  0x13   : > { %s860_s10 = sadd.s32 4294967295, %s768_s17   ;;  %p76_p7 = scmp.ne.s32.totalorder %s752_s13, %s748_s12 }
  0x14   : > { %p77_p8 = scmp.eq.s32.totalorder %s860_s10, 0  ;;  %p454_p9 = scmp.ge.s32.totalorder %s768_s17, 1 }
  0x15   : > { %p139_p10 = scmp.lt.s32.totalorder %s768_s17, 5  ;;  %s153_s22 = sshll.u32 %s929_s0, 4  ;;  %s154_s22 = int_to_ptr.hbm [resolvable:$true] %s153_s22 }
  0x16   : > { %p869_p11 = por %p77_p8, %p76_p7  ;;  %s772_s12 = smov [#allocation3]  }
  0x17   : > { %p873_p12 = pnand %p454_p9, %p139_p10  ;;  %s155_s24 = sshll.u32 %s772_s12, 4  ;;  %s156_s24 = int_to_ptr.vmem [resolvable:$true] %s155_s24 }
  0x18   : > { %s194_s28 = scalar_lea.hbm %s931_s2, %s764_s16  ;;  %s191_s30 = scalar_lea.vmem [#allocation8], %s168_s23 }
  0x19   : > { %p523_p13 = pneg %p873_p12  ;;  %s196_s29 = sshll.u32 %s194_s28, 4  ;;  %s197_s29 = int_to_ptr.hbm [resolvable:$true] %s196_s29 }
  0x1a   : > { %s198_s4 = sshll.u32 %s191_s30, 4  ;;  %207 = sbr.rel (%p873_p12) target bundleno = 229 (0xe5), region = 32  ;;  %s199_s4 = int_to_ptr.vmem [resolvable:$true] %s198_s4 }
  0x1b   : > { %p524_p0 = pnand %p523_p13, %p77_p8 }
  0x1c   : > { %533 = dma.hbm_to_vmem [thread:$0]  (!%p853_p6), %s197_s29, 16, %s199_s4, %s167_s7  }
  0x1d   : > { %526 = dma.hbm_to_vmem [thread:$0]  (!%p524_p0), %s154_s22, 128, %s156_s24, [#allocation4]  }
  0x1f   : > { %735 = dma.done.wait (%p77_p8), [#allocation4], 128  }
  0x20   : > { %737 = vsyncadd (%p77_p8), [#allocation4], 4294967168  ;;  %s214_s5 = sand.u32 1, %s860_s10   ;;  %s216_s23 = sand.u32 1, %s752_s13  }
  0x21   : > { %s462_s8 = sshll.u32 %s216_s23, 6  ;;  %s215_s9 = scalar_lea.sflag [#allocation7], %s214_s5 }
  0x22   : > { %s218_s20 = scalar_lea.vmem [#allocation6], %s462_s8 }
  0x23   : > { %739 = dma.done.wait (%p869_p11), %s215_s9, 1040  }
  0x24   : > { %741 = vsyncadd (%p869_p11), %s215_s9, 4294966256  ;;  %s227_s6 = scalar_lea.vmem [#allocation8], %s216_s23  ;;  %p463_p1 = scmp.ne.s32.totalorder %s760_s15, 0 }
  0x26   : > { %253 = sbr.rel (%p463_p1) target bundleno = 45 (0x2d), region = 48 }
  0x2b   : > { %v254_v0 = vld [vmem:[#allocation3] sm:$0xff] }
  0x2c   : > { %255 = vst [vmem:[#allocation2] sm:$0xff] %v254_v0 }
  0x2d PF: > { %v510_v1 = vld [vmem:[%s218_s20 + $0x38] sm:$0xff]  ;;  %v509_v2 = vld [vmem:[%s218_s20 + $0x30] sm:$0xff]  ;;  %v508_v3 = vld [vmem:[%s218_s20 + $0x28] sm:$0xff]  ;;  %p496_p2 = scmp.ge.s32.totalorder %s760_s15, 3 }
  0x2e   : > { %326 = vmatpush.bf16.msra.mxu0 %v510_v1  ;;  %v507_v4 = vld [vmem:[%s218_s20 + $0x20] sm:$0xff]  ;;  %v506_v5 = vld [vmem:[%s218_s20 + $0x18] sm:$0xff]  ;;  %v505_v6 = vld [vmem:[%s218_s20 + $0x10] sm:$0xff] }
  0x2f   : > { %v504_v7 = vld [vmem:[%s218_s20 + $0x8] sm:$0xff]  ;;  %v503_v8 = vld [vmem:[%s218_s20] sm:$0xff]  ;;  %v591_v11 = vld [vmem:[%s227_s6] ss:$0 sm:$0xff] }
  0x32   : > { %327 = vmatpush.bf16.msra.mxu0 %v509_v2 }
  0x33   : > { %v256_v9 = vld [vmem:[#allocation2] sm:$0xff] }
  0x34   : > { %v257_v10 = vpack.c.bf16 %v256_v9, %v256_v9 }
  0x36   : > { %328 = vmatpush.bf16.msra.mxu0 %v508_v3 }
  0x3a   : > { %329 = vmatpush.bf16.msra.mxu0 %v507_v4 }
  0x3e   : > { %330 = vmatpush.bf16.msra.mxu0 %v506_v5 }
  0x42   : > { %331 = vmatpush.bf16.msra.mxu0 %v505_v6 }
  0x46   : > { %332 = vmatpush.bf16.msra.mxu0 %v504_v7 }
  0x4a   : > { %333 = vmatpush.bf16.msra.mxu0 %v503_v8 }
  0x4d   : > { %334 = vmatmul.bf16.vlgmr.msra.gmra.mxu0 %v257_v10 }
  0xca   : > { %v335_v12 = vpop.f32.mrf.mxu0 }
  0xcb   : > { %v336_v13 = vadd.f32 %v591_v11, %v335_v12 }
  0xce   : > { %342 = sbr.rel (%p496_p2) target bundleno = 214 (0xd6), region = 52 }
  0xd2   : > { %v337_v14 = vpop.f32.mrf.mxu0 }
  0xd3   : > { %v343_v15 = vmax.f32 %v336_v13, 0.0 }
  0xd5   : > { %344 = vst [vmem:[#allocation2] sm:$0xff] %v343_v15 }
  0xd6 PF: > { %p497_p3 = scmp.ne.s32.totalorder %s760_s15, 3 }
  0xd8   : > { %348 = sbr.rel (%p497_p3) target bundleno = 223 (0xdf), region = 56 }
  0xdd   : > { %349 = vst [vmem:[#allocation2] sm:$0xff] %v336_v13 }
  0xde   : > { %350 = vst [vmem:[#allocation9] sm:$0xff] %v336_v13 }
  0xdf PF: > { %p537_p4 = scmp.eq.s32.totalorder %s860_s10, 3  ;;  %s361_s19 = sshll.u32 %s932_s3, 4  ;;  %s362_s19 = int_to_ptr.hbm [resolvable:$true] %s361_s19 }
  0xe0   : > { %s773_s21 = smov [#allocation9]  }
  0xe1   : > { %s359_s22 = sshll.u32 %s773_s21, 4  ;;  %s360_s22 = int_to_ptr.vmem [resolvable:$true] %s359_s22 }
  0xe2   : > { %520 = dma.vmem_to_hbm [thread:$0]  (%p537_p4), %s360_s22, 128, %s362_s19, [#allocation5]  }
  0xe3   : > { %743 = dma.done.wait (%p537_p4), [#allocation5], 128  }
  0xe4   : > { %745 = vsyncadd (%p537_p4), [#allocation5], 4294967168 }
  0xe5 PF: > { %s18_s17 = sadd.s32 1, %s768_s17   ;;  %s937_s12 = smov %s752_s13 }
  0xe6   : > { %p15_p5 = scmp.ge.s32.totalorder %s18_s17, 6   ;;  %s938_s13 = smov %s756_s14 }
  0xe7   : > { %s939_s14 = smov %s842_s25  ;;  %s940_s15 = smov %s764_s16 }
  0xe8   : > { %s941_s16 = smov %s943_s18  ;;  %17 = sbr.rel (!%p15_p5) target bundleno = 6 (0x6), region = 99 }
  0xed   :  { %375 = vsyncpa [#allocation4], 1 }
  0xee   :  { %377 = vsyncpa [#allocation4 + $0x1], 1 }
  0xef   :  { %378 = vsyncpa [#allocation7], 1 }
  0xf0   :  { %380 = vsyncpa [#allocation7 + $0x1], 1 }
  0xf1   :  { %381 = vsyncpa [#allocation5], 1 }
  0xf2   :  { %383 = vsyncpa [#allocation5 + $0x1], 1 }

</bundles_post_ra>
